<compile_context>
chip_gen: v7x
topology: tpu7x:2x2x1
jax: 0.10.0
libtpu: 0.0.40
codegen_flags: <defaults>
</compile_context>

<pallas_src>
import functools

import jax
import jax.numpy as jnp
from jax import lax
from jax.experimental import pallas as pl
from jax.experimental.pallas import tpu as pltpu


# ----------------------------- hyper-params (small, deterministic) -----------------------------
class hyp:
    B, S, N = 2, 2, 2
    H, W = 16, 16
    PH, PW = 8, 8
    V = 128                      # lidar points per frame
    Z, Y, X = 16, 16, 16
    view_depth = 8
    feat_dim = 32
    do_feat = True
    do_occ = False               # TODO(synk): OccNet definition not available in the module source
    do_view = False              # TODO(synk): ViewNet definition not available in the module source
    do_emb2D = False             # TODO(synk): EmbNet2D definition not available in the module source
    do_emb3D = False             # TODO(synk): EmbNet3D definition not available in the module source


XMIN, XMAX = -8.0, 8.0
YMIN, YMAX = -8.0, 8.0
ZMIN, ZMAX = 0.0, 16.0
EPS = 1e-6
BIG_DEPTH = 100.0

# NOTE(v7x): all kernels run a single grid step; at these toy shapes the per-step overhead of a
# 'parallel' axis outweighs any 2-TensorCore win, so megacore sharding is intentionally not used.
# If shapes grow (larger V / n_vox / NV), add a leading 'parallel' grid axis.
_SINGLE = pltpu.CompilerParams(dimension_semantics=("arbitrary",))


def _round_up(x, m):
    return ((x + m - 1) // m) * m


# ========================================= Pallas kernels ======================================
# K1: fused batched 4x4 transform as a block-diagonal MXU matmul.
#     All transform call-sites of the forward are stacked along M, padded to one lane width.
def _blockdiag_transform_kernel(t_ref, x_ref, o_ref):
    o_ref[...] = jnp.dot(t_ref[...], x_ref[...], preferred_element_type=jnp.float32)


def apply_4x4_fused(segments):
    """segments: list of (T (Mi,4,4), pts (Mi,Vi,3), w).  Returns list of (Mi,Vi,3).
    One pallas_call for ALL transforms: out = blockdiag(T_1..T_M) @ X, X = (4M, Vpad)."""
    Vpad = max(_round_up(p.shape[1], 128) for _, p, _ in segments)
    mats, slabs, metas = [], [], []
    for T, pts, w in segments:
        Mi, Vi, _ = pts.shape
        metas.append((Mi, Vi))
        xh = jnp.concatenate([jnp.swapaxes(pts.astype(jnp.float32), 1, 2),
                              jnp.full((Mi, 1, Vi), w, jnp.float32)], axis=1)        # (Mi, 4, Vi)
        xh = jnp.pad(xh, ((0, 0), (0, 0), (0, Vpad - Vi)))
        slabs.append(xh)
        mats.append(T.astype(jnp.float32))
    Tcat = jnp.concatenate(mats, axis=0)
    Xcat = jnp.concatenate(slabs, axis=0)
    Mtot = Tcat.shape[0]
    if (4 * Mtot) % 8 != 0:                           # keep the slab sublane-dense
        Tcat = jnp.concatenate(
            [Tcat, jnp.broadcast_to(jnp.eye(4, dtype=jnp.float32), (1, 4, 4))], axis=0)
        Xcat = jnp.concatenate([Xcat, jnp.zeros((1, 4, Vpad), jnp.float32)], axis=0)
        Mtot += 1
    Tbd = jnp.einsum('mij,mn->minj', Tcat,
                     jnp.eye(Mtot, dtype=jnp.float32)).reshape(4 * Mtot, 4 * Mtot)
    Xslab = Xcat.reshape(4 * Mtot, Vpad)
    R = 4 * Mtot
    out = pl.pallas_call(
        _blockdiag_transform_kernel,
        out_shape=jax.ShapeDtypeStruct((R, Vpad), jnp.float32),
        grid=(1,),
        in_specs=[pl.BlockSpec((R, R), lambda i: (0, 0)),
                  pl.BlockSpec((R, Vpad), lambda i: (0, 0))],
        out_specs=pl.BlockSpec((R, Vpad), lambda i: (0, 0)),
        compiler_params=_SINGLE,
        cost_estimate=pl.CostEstimate(flops=2 * R * R * Vpad, transcendentals=0,
                                      bytes_accessed=4 * (R * R + 2 * R * Vpad)),
    )(Tbd, Xslab)
    out = out.reshape(Mtot, 4, Vpad)
    results, off = [], 0
    for (Mi, Vi) in metas:
        results.append(jnp.swapaxes(out[off:off + Mi, :3, :Vi], 1, 2))
        off += Mi
    return results


# K2: fused occupancy voxelization + depth-image min-scatter.
#     Point data lives in SMEM (scalar splats); accumulators are dense int32/f32 slabs.
def _scatter_kernel(vox_ref, pix_ref, z_ref, occ_ref, depth_ref, *, n_vox, big):
    M, V = vox_ref.shape
    vc = n_vox // 8
    dr, dc = depth_ref.shape
    vox_ids = (lax.broadcasted_iota(jnp.int32, (8, vc), 0) * vc
               + lax.broadcasted_iota(jnp.int32, (8, vc), 1))                   # dense voxel ids
    pix_ids = (lax.broadcasted_iota(jnp.int32, (dr, dc), 0) * dc
               + lax.broadcasted_iota(jnp.int32, (dr, dc), 1))                  # global pixel ids
    depth = jnp.full((dr, dc), big, jnp.float32)
    for m in range(M):
        def body(p, carry, m=m):
            occ_acc, dep = carry
            vid = vox_ref[m, p]                       # SMEM scalar (−1 == invalid)
            pid = pix_ref[m, p]
            zz = z_ref[m, p]
            occ_acc = jnp.where(vox_ids == vid, 1, occ_acc)
            dep = jnp.minimum(dep, jnp.where(pix_ids == pid, zz, big))
            return occ_acc, dep
        occ_acc, depth = lax.fori_loop(
            0, V, body, (jnp.zeros((8, vc), jnp.int32), depth), unroll=8)
        occ_ref[m] = occ_acc.astype(jnp.float32)      # one dense (8, n_vox/8) store per frame
    depth_ref[...] = depth


def scatter_occ_and_depth(xyz_cam, pix_T_cam, Zd, Yd, Xd, H, W):
    """xyz_cam: (M, V, 3) camX points -> occ (M,1,Zd,Yd,Xd), depth (M,1,H,W), valid (M,1,H,W)."""
    M, V, _ = xyz_cam.shape
    n_vox = Zd * Yd * Xd
    assert n_vox % 8 == 0 and (M * H * W) % 8 == 0
    flat_vox, valid_vox = cam2mem_inds(xyz_cam, Zd, Yd, Xd)
    vox_id = jnp.where(valid_vox > 0, flat_vox, -1).astype(jnp.int32)
    fx, fy, cx, cy = split_intrinsics(pix_T_cam)
    x, y, z = xyz_cam[..., 0], xyz_cam[..., 1], xyz_cam[..., 2]
    zc = jnp.where(z < 1e-4, 1e-4, z)
    u = jnp.round(fx[:, None] * x / zc + cx[:, None]).astype(jnp.int32)
    v = jnp.round(fy[:, None] * y / zc + cy[:, None]).astype(jnp.int32)
    valid_p = (z > 1e-4) & (u >= 0) & (u < W) & (v >= 0) & (v < H)
    base = (jnp.arange(M, dtype=jnp.int32) * (H * W))[:, None]
    pix_id = jnp.where(valid_p, base + v * W + u, -1).astype(jnp.int32)
    zvals = jnp.where(valid_p, z, BIG_DEPTH).astype(jnp.float32)

    occ, depth = pl.pallas_call(
        functools.partial(_scatter_kernel, n_vox=n_vox, big=BIG_DEPTH),
        out_shape=(jax.ShapeDtypeStruct((M, 8, n_vox // 8), jnp.float32),
                   jax.ShapeDtypeStruct((8, (M * H * W) // 8), jnp.float32)),
        grid=(1,),
        in_specs=[pl.BlockSpec(memory_space=pltpu.MemorySpace.SMEM)] * 3,
        out_specs=(pl.BlockSpec((M, 8, n_vox // 8), lambda i: (0, 0, 0)),
                   pl.BlockSpec((8, (M * H * W) // 8), lambda i: (0, 0))),
        compiler_params=_SINGLE,
        cost_estimate=pl.CostEstimate(flops=2 * M * V * (n_vox + H * W), transcendentals=0,
                                      bytes_accessed=4 * (3 * M * V + M * n_vox + M * H * W)),
    )(vox_id, pix_id, zvals)
    occ = occ.reshape(M, 1, Zd, Yd, Xd)
    depth = depth.reshape(M, H * W)
    valid = (depth < BIG_DEPTH - 1.0).astype(jnp.float32)
    depth = jnp.where(valid > 0, depth, 0.0)
    return occ, depth.reshape(M, 1, H, W), valid.reshape(M, 1, H, W)


def maxpool_occ_2x(occ):
    """(M, 1, Z, Y, X) -> (M, 1, Z/2, Y/2, X/2); equals voxelizing at half resolution."""
    M, C, Zd, Yd, Xd = occ.shape
    return occ.reshape(M, C, Zd // 2, 2, Yd // 2, 2, Xd // 2, 2).max(axis=(3, 5, 7))


# K3: masked mean over the frustum-depth axis (utils_basic.reduce_masked_mean, dim=2).
def _masked_mean_kernel(x_ref, m_ref, o_ref):
    x = x_ref[...]                                                # (D, P)
    m = m_ref[...]
    num = jnp.sum(x * m, axis=0, keepdims=True)
    den = jnp.sum(m, axis=0, keepdims=True)
    o_ref[...] = num * pl.reciprocal(den + EPS, approx=True)      # divide on the EUP slot


def reduce_masked_mean_dim2_multi(pairs):
    """pairs: list of (x, m), each (B, C, D, PH, PW) with common D -> list of (B, C, PH, PW)."""
    D = pairs[0][0].shape[2]
    xs, ms, metas = [], [], []
    for x, m in pairs:
        Bq, Cq, Dq, PHq, PWq = x.shape
        assert Dq == D
        metas.append((Bq, Cq, PHq, PWq))
        xs.append(jnp.transpose(x, (2, 0, 1, 3, 4)).reshape(D, -1).astype(jnp.float32))
        ms.append(jnp.transpose(m, (2, 0, 1, 3, 4)).reshape(D, -1).astype(jnp.float32))
    xcat = jnp.concatenate(xs, axis=1)
    mcat = jnp.concatenate(ms, axis=1)
    P = xcat.shape[1]
    out = pl.pallas_call(
        _masked_mean_kernel,
        out_shape=jax.ShapeDtypeStruct((1, P), jnp.float32),
        grid=(1,),
        in_specs=[pl.BlockSpec((D, P), lambda i: (0, 0)),
                  pl.BlockSpec((D, P), lambda i: (0, 0))],
        out_specs=pl.BlockSpec((1, P), lambda i: (0, 0)),
        compiler_params=_SINGLE,
    )(xcat, mcat)[0]
    outs, off = [], 0
    for (Bq, Cq, PHq, PWq) in metas:
        n = Bq * Cq * PHq * PWq
        outs.append(out[off:off + n].reshape(Bq, Cq, PHq, PWq))
        off += n
    return outs


# K4: FeatNet stand-in — fused per-voxel 2-layer MLP (1x1x1 convs) + ReLU + channel L2 norm.
#     Single (Cin, B*S*NV) lane-dense slab; layer-1 broadcasts once per weight column,
#     layer-2 one MXU dot with N = B*S*NV; per-frame dense (Cout, NV) output slices.
def _featnet_kernel(x_ref, w1t_ref, b1_ref, w2t_ref, b2_ref, o_ref, *, nv):
    x = x_ref[...]                                                # (Cin, M*NV)
    w1t = w1t_ref[...]                                            # (Cmid, Cin)
    cin = x.shape[0]
    acc = w1t[:, 0:1] * x[0:1, :]
    for k in range(1, cin):
        acc = acc + w1t[:, k:k + 1] * x[k:k + 1, :]
    h = jnp.maximum(acc + b1_ref[...], 0.0)                       # (Cmid, M*NV)  VPU layer
    o = jnp.dot(w2t_ref[...], h, preferred_element_type=jnp.float32) + b2_ref[...]   # MXU layer
    o = jnp.maximum(o, 0.0)
    o = o * lax.rsqrt(jnp.sum(o * o, axis=0, keepdims=True) + EPS)
    M = o_ref.shape[0]
    for m in range(M):
        o_ref[m] = o[:, m * nv:(m + 1) * nv]                      # dense aligned lane-slices


def featnet_apply(x_slab, params, M, nv):
    """x_slab: (Cin, M*nv) channels-on-sublanes, voxels-on-lanes -> (M, Cout, nv)."""
    w1, b1, w2, b2 = params                                       # (cin,cmid),(1,cmid),(cmid,cout),(1,cout)
    cin, cmid = w1.shape
    cout = w2.shape[1]
    nvtot = x_slab.shape[1]
    assert nvtot == M * nv
    w1t = jnp.transpose(w1).astype(jnp.float32)                   # (Cmid, Cin)
    b1c = b1.reshape(cmid, 1).astype(jnp.float32)
    w2t = jnp.transpose(w2).astype(jnp.float32)                   # (Cout, Cmid)
    b2c = b2.reshape(cout, 1).astype(jnp.float32)
    flops = nvtot * (2 * cin * cmid + 2 * cmid * cout + 4 * cout)
    return pl.pallas_call(
        functools.partial(_featnet_kernel, nv=nv),
        out_shape=jax.ShapeDtypeStruct((M, cout, nv), jnp.float32),
        grid=(1,),
        in_specs=[pl.BlockSpec((cin, nvtot), lambda i: (0, 0)),
                  pl.BlockSpec((cmid, cin), lambda i: (0, 0)),
                  pl.BlockSpec((cmid, 1), lambda i: (0, 0)),
                  pl.BlockSpec((cout, cmid), lambda i: (0, 0)),
                  pl.BlockSpec((cout, 1), lambda i: (0, 0))],
        out_specs=pl.BlockSpec((M, cout, nv), lambda i: (0, 0, 0)),
        compiler_params=_SINGLE,
        cost_estimate=pl.CostEstimate(flops=flops, transcendentals=nvtot,
                                      bytes_accessed=4 * (cin * nvtot + cout * nvtot)),
    )(x_slab.astype(jnp.float32), w1t, b1c, w2t, b2c)


# ========================================= geometry glue =======================================
def pack_seqdim(x, B):
    return x.reshape((B * x.shape[1],) + x.shape[2:])


def unpack_seqdim(x, B):
    return x.reshape((B, x.shape[0] // B) + x.shape[1:])


def safe_inverse(T):
    R = T[..., :3, :3]
    t = T[..., :3, 3:4]
    Rt = jnp.swapaxes(R, -1, -2)
    tinv = -jnp.matmul(Rt, t)
    top = jnp.concatenate([Rt, tinv], axis=-1)
    bot = jnp.broadcast_to(jnp.array([0.0, 0.0, 0.0, 1.0], T.dtype), T.shape[:-2] + (1, 4))
    return jnp.concatenate([top, bot], axis=-2)


def eul2rotm(rx, ry, rz):
    cx, sx = jnp.cos(rx), jnp.sin(rx)
    cy, sy = jnp.cos(ry), jnp.sin(ry)
    cz, sz = jnp.cos(rz), jnp.sin(rz)
    one, zero = jnp.ones_like(cx), jnp.zeros_like(cx)
    Rx = jnp.stack([jnp.stack([one, zero, zero], -1),
                    jnp.stack([zero, cx, -sx], -1),
                    jnp.stack([zero, sx, cx], -1)], -2)
    Ry = jnp.stack([jnp.stack([cy, zero, sy], -1),
                    jnp.stack([zero, one, zero], -1),
                    jnp.stack([-sy, zero, cy], -1)], -2)
    Rz = jnp.stack([jnp.stack([cz, -sz, zero], -1),
                    jnp.stack([sz, cz, zero], -1),
                    jnp.stack([zero, zero, one], -1)], -2)
    return Rz @ Ry @ Rx


def split_intrinsics(pix_T_cam):
    return (pix_T_cam[..., 0, 0], pix_T_cam[..., 1, 1],
            pix_T_cam[..., 0, 2], pix_T_cam[..., 1, 2])


def scale_intrinsics(pix_T_cam, sx, sy):
    Smat = jnp.diag(jnp.array([sx, sy, 1.0, 1.0], jnp.float32))
    return jnp.einsum('ij,...jk->...ik', Smat, pix_T_cam)


def apply_pix_T_cam(pix_T_cam, xyz):
    fx, fy, cx, cy = split_intrinsics(pix_T_cam)
    x, y, z = xyz[..., 0], xyz[..., 1], xyz[..., 2]
    z = jnp.where(jnp.abs(z) < 1e-4, 1e-4, z)
    u = fx[:, None] * x / z + cx[:, None]
    v = fy[:, None] * y / z + cy[:, None]
    return jnp.stack([u, v], -1)


def pixel_ray_dirs(pix_T_cam, H, W):
    """Per-pixel camera-frame ray directions ((u-cx)/fx, (v-cy)/fy, 1): (M, H*W, 3)."""
    fx, fy, cx, cy = split_intrinsics(pix_T_cam)
    v, u = jnp.meshgrid(jnp.arange(H, dtype=jnp.float32),
                        jnp.arange(W, dtype=jnp.float32), indexing='ij')
    u = u.reshape(-1)[None]
    v = v.reshape(-1)[None]
    x = (u - cx[:, None]) / fx[:, None]
    y = (v - cy[:, None]) / fy[:, None]
    return jnp.stack([x, y, jnp.ones_like(x)], -1)


def mem_centers_cam(Zd, Yd, Xd):
    gz, gy, gx = jnp.meshgrid(jnp.arange(Zd), jnp.arange(Yd), jnp.arange(Xd), indexing='ij')
    x = XMIN + (gx.astype(jnp.float32) + 0.5) * (XMAX - XMIN) / Xd
    y = YMIN + (gy.astype(jnp.float32) + 0.5) * (YMAX - YMIN) / Yd
    z = ZMIN + (gz.astype(jnp.float32) + 0.5) * (ZMAX - ZMIN) / Zd
    return jnp.stack([x, y, z], -1).reshape(-1, 3)                # (Zd*Yd*Xd, 3)


def cam2mem_inds(xyz, Zd, Yd, Xd):
    ix = jnp.round((xyz[..., 0] - XMIN) / (XMAX - XMIN) * Xd - 0.5).astype(jnp.int32)
    iy = jnp.round((xyz[..., 1] - YMIN) / (YMAX - YMIN) * Yd - 0.5).astype(jnp.int32)
    iz = jnp.round((xyz[..., 2] - ZMIN) / (ZMAX - ZMIN) * Zd - 0.5).astype(jnp.int32)
    valid = ((ix >= 0) & (ix < Xd) & (iy >= 0) & (iy < Yd) & (iz >= 0) & (iz < Zd))
    ix = jnp.clip(ix, 0, Xd - 1)
    iy = jnp.clip(iy, 0, Yd - 1)
    iz = jnp.clip(iz, 0, Zd - 1)
    return iz * (Yd * Xd) + iy * Xd + ix, valid.astype(jnp.float32)


def unproject_rgb_to_mem(rgb, Zd, Yd, Xd, pix_T_cam):
    # TODO(synk): original uses bilinear F.grid_sample; nearest-neighbor sampling used here.
    # TODO(synk): gather left in XLA; a VMEM-resident jnp.take kernel would remove this glue.
    M, C, H, W = rgb.shape
    xyz = mem_centers_cam(Zd, Yd, Xd)
    fx, fy, cx, cy = split_intrinsics(pix_T_cam)
    x, y, z = xyz[:, 0][None], xyz[:, 1][None], xyz[:, 2][None]
    zc = jnp.where(z < 1e-4, 1e-4, z)
    u = jnp.round(fx[:, None] * x / zc + cx[:, None]).astype(jnp.int32)
    v = jnp.round(fy[:, None] * y / zc + cy[:, None]).astype(jnp.int32)
    valid = ((u >= 0) & (u < W) & (v >= 0) & (v < H) & (z > 0)).astype(jnp.float32)
    u = jnp.clip(u, 0, W - 1)
    v = jnp.clip(v, 0, H - 1)
    flat = v * W + u
    rgb_flat = rgb.reshape(M, C, H * W)
    idx = jnp.broadcast_to(flat[:, None, :], (M, C, flat.shape[1]))
    samp = jnp.take_along_axis(rgb_flat, idx, axis=2) * valid[:, None, :]
    return samp.reshape(M, C, Zd, Yd, Xd)


def get_inbounds(xyz, Zd, Yd, Xd):
    _, valid = cam2mem_inds(xyz, Zd, Yd, Xd)
    return valid


def sample_vox_nearest(vox, xyz_cam, Zd, Yd, Xd):
    """vox: (M, C, Zd, Yd, Xd); xyz_cam: (M, P, 3) in vox's camera frame -> (M, C, P)."""
    # TODO(synk): trilinear in the reference; nearest + XLA gather here.
    M, C = vox.shape[:2]
    flat, valid = cam2mem_inds(xyz_cam, Zd, Yd, Xd)
    vox_flat = vox.reshape(M, C, Zd * Yd * Xd)
    idx = jnp.broadcast_to(flat[:, None, :], (M, C, flat.shape[1]))
    return jnp.take_along_axis(vox_flat, idx, axis=2) * valid[:, None, :]


def resample_voxs_with_coords(xyz_X, vox_list, Zd, Yd, Xd, B, Ssub):
    """Resample voxel grids onto the camX0 grid using warp coords from the fused K1 call."""
    outs = []
    for vox in vox_list:
        Ci = vox.shape[2]
        samp = sample_vox_nearest(vox.reshape(B * Ssub, Ci, Zd, Yd, Xd), xyz_X, Zd, Yd, Xd)
        outs.append(samp.reshape(B, Ssub, Ci, Zd, Yd, Xd))
    return outs


def frustum_xyz_camX(pix_T_cam, D, PH, PW):
    """Frustum sample points (D x PH x PW) in the camera-X frame: (B, D*PH*PW, 3)."""
    fx, fy, cx, cy = split_intrinsics(pix_T_cam)
    d = jnp.linspace(2.0, 14.0, D)
    v, u = jnp.meshgrid(jnp.arange(PH, dtype=jnp.float32),
                        jnp.arange(PW, dtype=jnp.float32), indexing='ij')
    z = jnp.broadcast_to(d[:, None, None], (D, PH, PW)).reshape(-1)
    uu = jnp.broadcast_to(u[None], (D, PH, PW)).reshape(-1)
    vv = jnp.broadcast_to(v[None], (D, PH, PW)).reshape(-1)
    x = (uu[None] - cx[:, None]) * z[None] / fx[:, None]
    y = (vv[None] - cy[:, None]) * z[None] / fy[:, None]
    return jnp.stack([x, y, jnp.broadcast_to(z[None], x.shape)], -1)         # (B, P, 3)


def downsample2(x):
    B, C, H, W = x.shape
    return x.reshape(B, C, H // 2, 2, W // 2, 2).mean(axis=(3, 5))


def boxes_to_corners_camR(boxes):
    """boxes: (M, N, 9) = [xc, yc, zc, lx, ly, lz, rx, ry, rz] -> corners (M, N*8, 3)."""
    M, N, _ = boxes.shape
    c = boxes[..., 0:3]
    l = boxes[..., 3:6]
    r = boxes[..., 6:9]
    signs = jnp.array([[sx, sy, sz] for sx in (-1.0, 1.0) for sy in (-1.0, 1.0) for sz in (-1.0, 1.0)],
                      jnp.float32)                                           # (8, 3)
    local = 0.5 * l[:, :, None, :] * signs[None, None]                       # (M, N, 8, 3)
    R = eul2rotm(r[..., 0], r[..., 1], r[..., 2])                            # (M, N, 3, 3)
    corners = jnp.einsum('mnij,mnkj->mnki', R, local) + c[:, :, None, :]
    return corners.reshape(M, N * 8, 3)


def init_featnet_params(key, cin, cmid, cout):
    k1, k2 = jax.random.split(key)
    w1 = jax.random.normal(k1, (cin, cmid), jnp.float32) * (1.0 / jnp.sqrt(cin))
    b1 = jnp.zeros((1, cmid), jnp.float32)
    w2 = jax.random.normal(k2, (cmid, cout), jnp.float32) * (1.0 / jnp.sqrt(cmid))
    b2 = jnp.zeros((1, cout), jnp.float32)
    return (w1, b1, w2, b2)


def make_rigid(key, n, angle_scale=0.1, trans_scale=0.5):
    k1, k2 = jax.random.split(key)
    ang = jax.random.uniform(k1, (n, 3), jnp.float32, -angle_scale, angle_scale)
    trans = jax.random.uniform(k2, (n, 3), jnp.float32, -trans_scale, trans_scale)
    R = eul2rotm(ang[:, 0], ang[:, 1], ang[:, 2])
    T = jnp.concatenate([jnp.concatenate([R, trans[:, :, None]], -1),
                         jnp.broadcast_to(jnp.array([[0.0, 0.0, 0.0, 1.0]], jnp.float32), (n, 1, 4))],
                        axis=-2)
    return T


# ========================================= forward pass ========================================
def carla_focus_forward(feed, featnet_params):
    results = dict()
    B, H, W, S, N = hyp.B, hyp.H, hyp.W, hyp.S, hyp.N
    Z, Y, X = hyp.Z, hyp.Y, hyp.X
    Z2, Y2, X2 = Z // 2, Y // 2, X // 2
    PH, PW = hyp.PH, hyp.PW
    Dv = hyp.view_depth
    NV2 = Z2 * Y2 * X2
    __p = lambda x: pack_seqdim(x, B)
    __u = lambda x: unpack_seqdim(x, B)

    total_loss = jnp.float32(0.0)

    rgb_camRs = feed['rgb_camRs']
    rgb_camXs = feed['rgb_camXs']
    pix_T_cams = feed['pix_T_cams']
    cam_T_velos = feed['cam_T_velos']
    origin_T_camRs = feed['origin_T_camRs']
    origin_T_camXs = feed['origin_T_camXs']

    camX0_T_camXs = jnp.einsum('bij,bsjk->bsik', safe_inverse(origin_T_camXs[:, 0]), origin_T_camXs)
    camRs_T_camXs = __u(jnp.matmul(safe_inverse(__p(origin_T_camRs)), __p(origin_T_camXs)))
    camXs_T_camRs = __u(safe_inverse(__p(camRs_T_camXs)))

    xyz_veloXs = feed['xyz_veloXs']
    cam_T_velos_ = __p(cam_T_velos)
    camRs_T_camXs_ = __p(camRs_T_camXs)
    camX0_T_camXs_ = camX0_T_camXs.reshape(B * S, 4, 4)
    pix_T_cams_ = __p(pix_T_cams)
    xyz_velo_ = __p(xyz_veloXs)

    # ---------------- glue inputs for the SINGLE fused K1 call ----------------
    rays_camXs_ = pixel_ray_dirs(pix_T_cams_, H, W)                          # (B*S, H*W, 3), w=0

    sy = float(PH) / float(H)
    sx = float(PW) / float(W)
    assert sx == 0.5 and sy == 0.5
    projpix_T_cams = __u(scale_intrinsics(pix_T_cams_, sx, sy))
    xyz_frust = frustum_xyz_camX(projpix_T_cams[:, 0], Dv, PH, PW)           # (B, Dv*PH*PW, 3)

    cents2 = mem_centers_cam(Z2, Y2, X2)                                     # (NV2, 3)
    cents2_b = jnp.broadcast_to(cents2[None], (B * (S - 1),) + cents2.shape)

    # boxes: shuffle valid-first (descending score) then corners in camR
    boxlist_camRs = feed['boxes3D']
    tidlist_s = feed['tids']
    scorelist_s = feed['scores']
    boxlist_camRs_, tidlist_s_, scorelist_s_ = __p(boxlist_camRs), __p(tidlist_s), __p(scorelist_s)
    order = jnp.argsort(-scorelist_s_, axis=1)
    boxlist_camRs_ = jnp.take_along_axis(boxlist_camRs_,
                                         jnp.broadcast_to(order[..., None], boxlist_camRs_.shape), axis=1)
    tidlist_s_ = jnp.take_along_axis(tidlist_s_, order, axis=1)
    scorelist_s_ = jnp.take_along_axis(scorelist_s_, order, axis=1)
    corners_camRs_ = boxes_to_corners_camR(boxlist_camRs_)                   # (B*S, N*8, 3)

    camXs_T_camX0_ = safe_inverse(camX0_T_camXs)                             # (B, S, 4, 4)

    segs = [
        (cam_T_velos_, xyz_velo_, 1.0),                                      # -> xyz_camXs_
        (jnp.matmul(camRs_T_camXs_, cam_T_velos_), xyz_velo_, 1.0),          # -> xyz_camRs_
        (jnp.matmul(camX0_T_camXs_, cam_T_velos_), xyz_velo_, 1.0),          # -> xyz_camX0s_
        (camRs_T_camXs_, rays_camXs_, 0.0),                                  # -> per-pixel rays in camR
        (camXs_T_camX0_[:, 0], xyz_frust, 1.0),                              # -> frustum pts in camX0
        (camXs_T_camX0_[:, 1], xyz_frust, 1.0),                              # -> frustum pts in camX1
        (camXs_T_camX0_[:, 1:].reshape(B * (S - 1), 4, 4), cents2_b, 1.0),   # -> resample warp coords
        (__p(camXs_T_camRs), corners_camRs_, 1.0),                           # -> box corners in camX
    ]
    (xyz_camXs_, xyz_camRs_, xyz_camX0s_, rays_camRs_,
     xyz_frust_X0, xyz_frust_X1, cents_in_X, corners_camXs_) = apply_4x4_fused(segs)   # Pallas K1

    xyz_camXs = __u(xyz_camXs_)
    xyz_camRs = __u(xyz_camRs_)
    xyz_camX0s = __u(xyz_camX0s_)

    # ---------------- fused voxel-occupancy + depth-image scatter (Pallas K2) ----------------
    occXs_, depth_camXs_, valid_scatter_ = scatter_occ_and_depth(
        xyz_camXs_, pix_T_cams_, Z, Y, X, H, W)
    occXs = __u(occXs_)
    # max-pool of full-res occupancy == half-res voxelization (up to exact-boundary ties)
    occXs_half = __u(maxpool_occ_2x(occXs_))
    unpXs = __u(unproject_rgb_to_mem(__p(rgb_camXs), Z, Y, X, pix_T_cams_))
    unpXs_half = __u(unproject_rgb_to_mem(__p(rgb_camXs), Z2, Y2, X2, pix_T_cams_))  # kept for parity

    # dense camR point cloud: z * (R @ ray) + t   (rays were transformed in the fused K1 call)
    t_R = camRs_T_camXs_[:, :3, 3]
    dense_xyz_camRs_ = depth_camXs_.reshape(B * S, H * W, 1) * rays_camRs_ + t_R[:, None, :]
    inbound_camXs_ = get_inbounds(dense_xyz_camRs_, Z, Y, X).reshape(B * S, 1, H, W)
    depth_camXs = __u(depth_camXs_)
    valid_camXs = __u(valid_scatter_) * __u(inbound_camXs_)
    # (summ_writer.* calls are TensorBoard logging only; omitted.)

    # ---------------- frustum projections + masked means (Pallas K3) ----------------
    unp_projX00 = sample_vox_nearest(unpXs[:, 0], xyz_frust_X0, Z, Y, X).reshape(B, 3, Dv, PH, PW)
    occ_projX00 = sample_vox_nearest(occXs[:, 0], xyz_frust_X0, Z, Y, X).reshape(B, 1, Dv, PH, PW)
    unp_projX01 = sample_vox_nearest(unpXs[:, 1], xyz_frust_X1, Z, Y, X).reshape(B, 3, Dv, PH, PW)
    occ_projX01 = sample_vox_nearest(occXs[:, 1], xyz_frust_X1, Z, Y, X).reshape(B, 1, Dv, PH, PW)
    occ_projX00 = jnp.tile(occ_projX00, (1, 3, 1, 1, 1))
    occ_projX01 = jnp.tile(occ_projX01, (1, 3, 1, 1, 1))
    projX00_vis, projX01_vis = reduce_masked_mean_dim2_multi(
        [(unp_projX00, occ_projX00), (unp_projX01, occ_projX01)])            # Pallas K3 (one call)
    rgb_X0 = downsample2(rgb_camXs[:, 0])

    # ---------------- 2D boxes from 3D boxes (corners came out of the fused K1 call) ----------
    xylist_camXs = apply_pix_T_cam(pix_T_cams_, corners_camXs_).reshape(B, S, N, 8, 2)
    xminlists = jnp.min(xylist_camXs[..., 0], axis=3)
    yminlists = jnp.min(xylist_camXs[..., 1], axis=3)
    xmaxlists = jnp.max(xylist_camXs[..., 0], axis=3)
    ymaxlists = jnp.max(xylist_camXs[..., 1], axis=3)
    boxlists = jnp.stack([yminlists, xminlists, ymaxlists, xmaxlists], axis=3)
    boxlists = boxlists / jnp.array([H, W, H, W], jnp.float32)               # normalize_boxlist2D

    if hyp.do_feat:
        featXs_input = jnp.concatenate([occXs, occXs * unpXs], axis=2)       # (B, S, 4, Z, Y, X)
        featXs_input_ = __p(featXs_input)
        # TODO(synk): utils_vox.get_freespace (per-ray free-space carving) has no clean Pallas
        # equivalent here; freeXs approximated with zeros.
        freeXs = jnp.zeros_like(occXs_half)
        visXs = jnp.clip(occXs_half + freeXs, 0.0, 1.0)

        # 2x2x2 mean-pool stays in XLA where it fuses with the occ*unp concat above.
        # TODO(synk): could be folded into K4 via a strided index_map if shapes grow.
        xi = featXs_input_.reshape(B * S, 4, Z2, 2, Y2, 2, X2, 2).mean(axis=(3, 5, 7))
        x_slab = jnp.transpose(xi.reshape(B * S, 4, NV2), (1, 0, 2)).reshape(4, B * S * NV2)
        featXs_ = featnet_apply(x_slab, featnet_params, B * S, NV2)          # Pallas K4 (one call)
        featXs_ = featXs_.reshape(B * S, hyp.feat_dim, Z2, Y2, X2)
        validXs_ = jnp.ones((B * S, 1, Z2, Y2, X2), jnp.float32)
        feat_loss = (jnp.mean(jnp.abs(featXs_[..., 1:, :, :] - featXs_[..., :-1, :, :]))
                     + jnp.mean(jnp.abs(featXs_[..., :, 1:, :] - featXs_[..., :, :-1, :]))
                     + jnp.mean(jnp.abs(featXs_[..., :, :, 1:] - featXs_[..., :, :, :-1])))
        total_loss = total_loss + feat_loss

        validXs = __u(validXs_)
        featXs = __u(featXs_)
        # warp coordinates shared by all three grids came from the fused K1 call
        _validX01, _visX01, _featX01 = resample_voxs_with_coords(
            cents_in_X, [validXs[:, 1:], visXs[:, 1:], featXs[:, 1:]], Z2, Y2, X2, B, S - 1)
        validX0s = jnp.concatenate([validXs[:, 0:1], _validX01], axis=1)
        visX0s = jnp.concatenate([visXs[:, 0:1], _visX01], axis=1)
        featX0s = jnp.concatenate([featXs[:, 0:1], _featX01], axis=1)
        emb3D_e = jnp.mean(featX0s[:, 1:], axis=1)
        vis3D_e = jnp.max(validX0s[:, 1:], axis=1) * jnp.max(visX0s[:, 1:], axis=1)
        emb3D_g = featX0s[:, 0]
        vis3D_g = validX0s[:, 0] * visX0s[:, 0]

    # TODO(synk): hyp.do_occ / do_view / do_emb2D / do_emb3D branches require OccNet / ViewNet /
    # EmbNet2D / EmbNet3D definitions not included in the module source; they are disabled.

    return total_loss, results


# ============================================== main ===========================================
if __name__ == "__main__":
    key = jax.random.PRNGKey(0)
    ks = jax.random.split(key, 12)
    B, S, N, H, W, V = hyp.B, hyp.S, hyp.N, hyp.H, hyp.W, hyp.V

    rgb_camRs = jax.random.uniform(ks[0], (B, S, 3, H, W), jnp.float32, -0.5, 0.5)
    rgb_camXs = jax.random.uniform(ks[1], (B, S, 3, H, W), jnp.float32, -0.5, 0.5)

    pix = jnp.array([[float(W), 0.0, W / 2.0, 0.0],
                     [0.0, float(H), H / 2.0, 0.0],
                     [0.0, 0.0, 1.0, 0.0],
                     [0.0, 0.0, 0.0, 1.0]], jnp.float32)
    pix_T_cams = jnp.broadcast_to(pix, (B, S, 4, 4))

    cam_T_velos = make_rigid(ks[2], B * S).reshape(B, S, 4, 4)
    origin_T_camRs = make_rigid(ks[3], B * S).reshape(B, S, 4, 4)
    origin_T_camXs = make_rigid(ks[4], B * S).reshape(B, S, 4, 4)

    xyz_veloXs = jnp.stack([
        jax.random.uniform(ks[5], (B, S, V), jnp.float32, -4.0, 4.0),
        jax.random.uniform(ks[6], (B, S, V), jnp.float32, -2.0, 2.0),
        jax.random.uniform(ks[7], (B, S, V), jnp.float32, 2.0, 14.0)], axis=-1)

    boxes3D = jnp.concatenate([
        jax.random.uniform(ks[8], (B, S, N, 3), jnp.float32, -2.0, 2.0) + jnp.array([0.0, 0.0, 8.0]),
        jax.random.uniform(ks[9], (B, S, N, 3), jnp.float32, 0.5, 2.0),
        jax.random.uniform(ks[10], (B, S, N, 3), jnp.float32, -0.3, 0.3)], axis=-1)
    tids = jnp.arange(B * S * N, dtype=jnp.int32).reshape(B, S, N)
    scores = jax.random.uniform(ks[11], (B, S, N), jnp.float32, 0.0, 1.0)

    feed = dict(rgb_camRs=rgb_camRs, rgb_camXs=rgb_camXs, pix_T_cams=pix_T_cams,
                cam_T_velos=cam_T_velos, origin_T_camRs=origin_T_camRs,
                origin_T_camXs=origin_T_camXs, xyz_veloXs=xyz_veloXs,
                boxes3D=boxes3D, tids=tids, scores=scores,
                writer=None, global_step=0, set_name='test')

    featnet_params = init_featnet_params(jax.random.PRNGKey(42), 4, hyp.feat_dim, hyp.feat_dim)

    total_loss, results = carla_focus_forward(feed, featnet_params)
    jax.block_until_ready(total_loss)
    print("KERNEL_OK")
</pallas_src>

<mosaic_0001>
module attributes {stable_mosaic.version = 11 : i64} {
  func.func @_blockdiag_transform_kernel(%arg0: i32, %arg1: memref<104x104xf32, #tpu.memory_space<vmem>>, %arg2: memref<104x512xf32, #tpu.memory_space<vmem>>, %arg3: memref<104x512xf32, #tpu.memory_space<vmem>>) attributes {dimension_semantics = [#tpu.dimension_semantics<arbitrary>], iteration_bounds = array<i64: 1>, scalar_prefetch = 0 : i64, scratch_operands = 0 : i64, tpu.core_type = #tpu.core_type<tc>, window_params = [{pipeline_mode = #tpu.pipeline_mode<synchronous>, transform_indices = @transform_0, window_bounds = array<i64: 104, 104>}, {pipeline_mode = #tpu.pipeline_mode<synchronous>, transform_indices = @transform_1, window_bounds = array<i64: 104, 512>}, {pipeline_mode = #tpu.pipeline_mode<synchronous>, transform_indices = @transform_2, window_bounds = array<i64: 104, 512>}]} {
    %c0 = arith.constant 0 : index
    %c0_0 = arith.constant 0 : index
    %0 = vector.load %arg1[%c0, %c0_0] : memref<104x104xf32, #tpu.memory_space<vmem>>, vector<104x104xf32>
    %c0_1 = arith.constant 0 : index
    %c0_2 = arith.constant 0 : index
    %1 = vector.load %arg2[%c0_1, %c0_2] : memref<104x512xf32, #tpu.memory_space<vmem>>, vector<104x512xf32>
    %cst = arith.constant dense<0.000000e+00> : vector<104x512xf32>
    %2 = tpu.matmul %0, %1, %cst {dimension_numbers = #tpu.dot_dimension_numbers<[1], [0], [0], [1], [0, 0, 1, 1], [], []>} : vector<104x104xf32>, vector<104x512xf32>, vector<104x512xf32> -> vector<104x512xf32>
    %c0_3 = arith.constant 0 : index
    %c0_4 = arith.constant 0 : index
    %3 = vector.load %arg3[%c0_3, %c0_4] : memref<104x512xf32, #tpu.memory_space<vmem>>, vector<104x512xf32>
    tpu.vector_store %arg3[%c0_3, %c0_4], %2 {strides = array<i32>} : memref<104x512xf32, #tpu.memory_space<vmem>>, vector<104x512xf32>,
    return
  }
  func.func @transform_0(%arg0: i32) -> (i32, i32) {
    %c0_i32 = arith.constant 0 : i32
    %c0_i32_0 = arith.constant 0 : i32
    %c0_i32_1 = arith.constant 0 : i32
    return %c0_i32, %c0_i32_0 : i32, i32
  }
  func.func @transform_1(%arg0: i32) -> (i32, i32) {
    %c0_i32 = arith.constant 0 : i32
    %c0_i32_0 = arith.constant 0 : i32
    %c0_i32_1 = arith.constant 0 : i32
    return %c0_i32, %c0_i32_0 : i32, i32
  }
  func.func @transform_2(%arg0: i32) -> (i32, i32) {
    %c0_i32 = arith.constant 0 : i32
    %c0_i32_0 = arith.constant 0 : i32
    %c0_i32_1 = arith.constant 0 : i32
    return %c0_i32, %c0_i32_0 : i32, i32
  }
}

</mosaic_0001>

<bundles_post_ra>
// kernel: tpu_custom_call.1
= control target key start
LH: loop header
LB: loop body
LE: loop exit
PB: predicated region body
PF: predicated region fallthrough
CT: control target
= control target key end

     0   :  { %7 = vsyncpa [#allocation3], 0  ;;  %s772_s0 = inlined_call_operand.hbm [shape: f32[104,104], index: 0, kind: input, shape index: {}]   ;;  %s773_s1 = inlined_call_operand.hbm [shape: f32[104,512], index: 1, kind: input, shape index: {}]   ;;  %s774_s2 = inlined_call_operand.hbm [shape: f32[104,512], index: 2, kind: output, shape index: {}]  }
   0x1   :  { %8 = vsyncpa [#allocation6], 0 }
   0x2   :  { %9 = vsyncpa [#allocation4], 0  ;;  %s655_s9 = smov [#allocation2]   ;;  %s583_s13 = scalar_lea.hbm %s772_s0, 1664 }
   0x3   :  { %s15_s10 = sshll.u32 %s655_s9, 4  ;;  %p584_p0 = scmp.ne.s32.totalorder %s772_s0, %s583_s13  ;;  %s16_s10 = int_to_ptr.vmem [resolvable:$true] %s15_s10 }
   0x4   :  { %p587_p1 = scmp.lt.u32.totalorder %s583_s13, %s772_s0 }
   0x6   :  { %p589_p2 = pnand %p587_p1, %p584_p0 }
   0x8   :  { %592 = shalt.err (!%p589_p2)
}
   0x9   :  { %s593_s18 = scalar_lea.vmem %s16_s10, 1664  ;;  %p598_p4 = scmp.lt.s32.totalorder %s16_s10, %s16_s10 }
   0xa   :  { %p594_p3 = scmp.ne.s32.totalorder %s16_s10, %s593_s18  ;;  %p599_p5 = scmp.lt.s32.totalorder %s593_s18, %s593_s18 }
   0xc   :  { %p600_p6 = por %p599_p5, %p598_p4 }
   0xe   :  { %p601_p7 = pnand %p600_p6, %p594_p3 }
  0x10   :  { %604 = shalt.err (!%p601_p7)
}
  0x11   :  { %s656_s19 = smov 128   ;;  %s657_s20 = smov 8  }
  0x12   :  { %21 = dma.hbm_to_vmem [thread:$0]  %s772_s0, 1664, %s16_s10, [#allocation3], %s656_s19, %s656_s19, %s657_s20  }
  0x13   :  { %s658_s23 = smov [#allocation5]   ;;  %s605_s27 = scalar_lea.hbm %s773_s1, 6656 }
  0x14   :  { %s27_s24 = sshll.u32 %s658_s23, 4  ;;  %p606_p8 = scmp.ne.s32.totalorder %s773_s1, %s605_s27  ;;  %s28_s24 = int_to_ptr.vmem [resolvable:$true] %s27_s24 }
  0x15   :  { %p609_p9 = scmp.lt.u32.totalorder %s605_s27, %s773_s1 }
  0x17   :  { %p611_p10 = pnand %p609_p9, %p606_p8 }
  0x19   :  { %614 = shalt.err (!%p611_p10)
}
  0x1a   :  { %s615_s4 = scalar_lea.vmem %s28_s24, 6656  ;;  %p620_p12 = scmp.lt.s32.totalorder %s28_s24, %s28_s24 }
  0x1b   :  { %p616_p11 = scmp.ne.s32.totalorder %s28_s24, %s615_s4  ;;  %p621_p13 = scmp.lt.s32.totalorder %s615_s4, %s615_s4 }
  0x1d   :  { %p622_p0 = por %p621_p13, %p620_p12 }
  0x1f   :  { %p623_p1 = pnand %p622_p0, %p616_p11 }
  0x21   :  { %626 = shalt.err (!%p623_p1)
}
  0x22   :  { %s659_s0 = smov 512   ;;  %s660_s5 = smov 32  }
  0x23   :  { %33 = dma.hbm_to_vmem [thread:$0]  %s773_s1, 6656, %s28_s24, [#allocation6], %s659_s0, %s659_s0, %s660_s5  }
  0x24   :  { %649 = dma.done.wait [#allocation3], 1664  }
  0x25   :  { %650 = vsyncadd [#allocation3], 4294965632 }
  0x26   :  { %651 = dma.done.wait [#allocation6], 6656  }
  0x27   :  { %652 = vsyncadd [#allocation6], 4294960640  ;;  %v661_v0 = vmov 0.0   ;;  %v54_v1 = vld [vmem:[#allocation5 + $0x8] sm:$0xff]  ;;  %v56_v3 = vld [vmem:[#allocation5 + $0x18] sm:$0xff]  ;;  %vm105_vm0 = vcmask 850944  }
  0x28   :  { %209 = vmatprep.mubr.f32.mxu0 %v661_v0  ;;  %352 = vmatprep.mubr.f32.mxu1 %v661_v0  ;;  %v58_v2 = vld [vmem:[#allocation5 + $0x28] sm:$0xff]  ;;  %v60_v5 = vld [vmem:[#allocation5 + $0x38] sm:$0xff]  ;;  %v53_v6 = vld [vmem:[#allocation5] sm:$0xff]  ;;  %s662_s1 = smov [#allocation7]  }
  0x29   :  { %v527_v4 = vpack.c.bf16 %v58_v2, %v54_v1  ;;  %v57_v7 = vld [vmem:[#allocation5 + $0x20] sm:$0xff]  ;;  %v551_v8 = vpack.c.bf16 %v60_v5, %v56_v3  ;;  %v55_v10 = vld [vmem:[#allocation5 + $0x10] sm:$0xff]  ;;  %v62_v12 = vld [vmem:[#allocation5 + $0x48] sm:$0xff]  ;;  %s488_s8 = sshll.u32 %s662_s1, 4  ;;  %s489_s8 = int_to_ptr.vmem [resolvable:$true] %s488_s8 }
  0x2a   :  { %v529_v9 = vpack.c.bf16 %v57_v7, %v53_v6  ;;  %v59_v11 = vld [vmem:[#allocation5 + $0x30] sm:$0xff]  ;;  %v66_v14 = vld [vmem:[#allocation5 + $0x68] sm:$0xff]  ;;  %v64_v15 = vld [vmem:[#allocation5 + $0x58] sm:$0xff]  ;;  %s627_s9 = scalar_lea.vmem %s489_s8, 6656  ;;  %p632_p3 = scmp.lt.s32.totalorder %s489_s8, %s489_s8 }
  0x2b   :  { %528 = vmatprep.subr.bf16.mxu0 %v527_v4  ;;  %v553_v13 = vpack.c.bf16 %v59_v11, %v55_v10  ;;  %v68_v16 = vld [vmem:[#allocation5 + $0x78] sm:$0xff]  ;;  %552 = vmatprep.subr.bf16.mxu1 %v551_v8  ;;  %v531_v17 = vpack.c.bf16 %v66_v14, %v62_v12  ;;  %v61_v19 = vld [vmem:[#allocation5 + $0x40] sm:$0xff]  ;;  %v63_v21 = vld [vmem:[#allocation5 + $0x50] sm:$0xff]  ;;  %p628_p2 = scmp.ne.s32.totalorder %s489_s8, %s627_s9  ;;  %p633_p4 = scmp.lt.s32.totalorder %s627_s9, %s627_s9 }
  0x2c   :  { %530 = vmatpush1.bf16.msra.mxu0 %v529_v9  ;;  %v555_v18 = vpack.c.bf16 %v68_v16, %v64_v15  ;;  %v65_v20 = vld [vmem:[#allocation5 + $0x60] sm:$0xff]  ;;  %v67_v23 = vld [vmem:[#allocation5 + $0x70] sm:$0xff]  ;;  %v70_v24 = vld [vmem:[#allocation5 + $0x88] sm:$0xff] }
  0x2d   :  { %554 = vmatpush1.bf16.msra.mxu1 %v553_v13  ;;  %v533_v22 = vpack.c.bf16 %v65_v20, %v61_v19  ;;  %v74_v25 = vld [vmem:[#allocation5 + $0xa8] sm:$0xff]  ;;  %532 = vmatprep.subr.bf16.mxu0 %v531_v17  ;;  %v557_v26 = vpack.c.bf16 %v67_v23, %v63_v21  ;;  %v72_v28 = vld [vmem:[#allocation5 + $0x98] sm:$0xff]  ;;  %v69_v30 = vld [vmem:[#allocation5 + $0x80] sm:$0xff]  ;;  %p634_p5 = por %p633_p4, %p632_p3 }
  0x2e   :  { %556 = vmatprep.subr.bf16.mxu1 %v555_v18  ;;  %v535_v27 = vpack.c.bf16 %v74_v25, %v70_v24  ;;  %v76_v29 = vld [vmem:[#allocation5 + $0xb8] sm:$0xff]  ;;  %v73_v32 = vld [vmem:[#allocation5 + $0xa0] sm:$0xff]  ;;  %v71_v33 = vld [vmem:[#allocation5 + $0x90] sm:$0xff] }
  0x2f   :  { %v559_v31 = vpack.c.bf16 %v76_v29, %v72_v28  ;;  %v75_v34 = vld [vmem:[#allocation5 + $0xb0] sm:$0xff]  ;;  %v537_v35 = vpack.c.bf16 %v73_v32, %v69_v30  ;;  %v78_v36 = vld [vmem:[#allocation5 + $0xc8] sm:$0xff]  ;;  %v80_v38 = vld [vmem:[#allocation5 + $0xd8] sm:$0xff]  ;;  %p635_p6 = pnand %p634_p5, %p628_p2 }
  0x30   :  { %534 = vmatpush1.bf16.msra.mxu0 %v533_v22  ;;  %v82_v37 = vld [vmem:[#allocation5 + $0xe8] sm:$0xff]  ;;  %v561_v39 = vpack.c.bf16 %v75_v34, %v71_v33  ;;  %v84_v41 = vld [vmem:[#allocation5 + $0xf8] sm:$0xff]  ;;  %v77_v42 = vld [vmem:[#allocation5 + $0xc0] sm:$0xff] }
  0x31   :  { %558 = vmatpush1.bf16.msra.mxu1 %v557_v26  ;;  %536 = vmatprep.subr.bf16.mxu0 %v535_v27  ;;  %v539_v40 = vpack.c.bf16 %v82_v37, %v78_v36  ;;  %v81_v43 = vld [vmem:[#allocation5 + $0xe0] sm:$0xff]  ;;  %v563_v44 = vpack.c.bf16 %v84_v41, %v80_v38  ;;  %v79_v45 = vld [vmem:[#allocation5 + $0xd0] sm:$0xff]  ;;  %v86_v47 = vld [vmem:[#allocation5 + $0x108] sm:$0xff] }
  0x32   :  { %560 = vmatprep.subr.bf16.mxu1 %v559_v31  ;;  %v83_v46 = vld [vmem:[#allocation5 + $0xf0] sm:$0xff]  ;;  %v90_v48 = vld [vmem:[#allocation5 + $0x128] sm:$0xff]  ;;  %v88_v49 = vld [vmem:[#allocation5 + $0x118] sm:$0xff]  ;;  %v541_v51 = vpack.c.bf16 %v81_v43, %v77_v42 }
  0x33   :  { %v92_v50 = vld [vmem:[#allocation5 + $0x138] sm:$0xff]  ;;  %v565_v52 = vpack.c.bf16 %v83_v46, %v79_v45  ;;  %v543_v53 = vpack.c.bf16 %v90_v48, %v86_v47  ;;  %v85_v54 = vld [vmem:[#allocation5 + $0x100] sm:$0xff]  ;;  %v87_v56 = vld [vmem:[#allocation5 + $0x110] sm:$0xff] }
  0x34   :  { %538 = vmatpush1.bf16.msra.mxu0 %v537_v35  ;;  %v89_v55 = vld [vmem:[#allocation5 + $0x120] sm:$0xff]  ;;  %v567_v57 = vpack.c.bf16 %v92_v50, %v88_v49  ;;  %v91_v58 = vld [vmem:[#allocation5 + $0x130] sm:$0xff]  ;;  %v94_v59 = vld [vmem:[#allocation5 + $0x148] sm:$0xff] }
  0x35   :  { %562 = vmatpush1.bf16.msra.mxu1 %v561_v39  ;;  %540 = vmatprep.subr.bf16.mxu0 %v539_v40  ;;  %v98_v60 = vld [vmem:[#allocation5 + $0x168] sm:$0xff]  ;;  %v96_v61 = vld [vmem:[#allocation5 + $0x158] sm:$0xff]  ;;  %v545_v63 = vpack.c.bf16 %v89_v55, %v85_v54  ;;  %v569_v1 = vpack.c.bf16 %v91_v58, %v87_v56  ;;  %v93_v3 = vld [vmem:[#allocation5 + $0x140] sm:$0xff] }
  0x36   :  { %564 = vmatprep.subr.bf16.mxu1 %v563_v44  ;;  %v100_v62 = vld [vmem:[#allocation5 + $0x178] sm:$0xff]  ;;  %v547_v2 = vpack.c.bf16 %v98_v60, %v94_v59  ;;  %v97_v4 = vld [vmem:[#allocation5 + $0x160] sm:$0xff]  ;;  %v95_v6 = vld [vmem:[#allocation5 + $0x150] sm:$0xff] }
  0x37   :  { %v571_v5 = vpack.c.bf16 %v100_v62, %v96_v61  ;;  %v99_v7 = vld [vmem:[#allocation5 + $0x170] sm:$0xff]  ;;  %v549_v8 = vpack.c.bf16 %v97_v4, %v93_v3  ;;  %v102_v10 = vld [vmem:[#allocation5 + $0x188] sm:$0xff]  ;;  %v104_v11 = vld [vmem:[#allocation5 + $0x198] sm:$0xff] }
  0x38   :  { %542 = vmatpush1.bf16.msra.mxu0 %v541_v51  ;;  %v573_v9 = vpack.c.bf16 %v99_v7, %v95_v6  ;;  %v101_v12 = vld [vmem:[#allocation5 + $0x180] sm:$0xff]  ;;  %v103_v13 = vld [vmem:[#allocation5 + $0x190] sm:$0xff]  ;;  %v40_v14 = vld [vmem:[#allocation2] sm:$0xff] }
  0x39   :  { %566 = vmatpush1.bf16.msra.mxu1 %v565_v52  ;;  %544 = vmatprep.subr.bf16.mxu0 %v543_v53  ;;  %v41_v15 = vld [vmem:[#allocation2 + $0x8] sm:$0xff]  ;;  %v42_v16 = vld [vmem:[#allocation2 + $0x10] sm:$0xff]  ;;  %v43_v17 = vld [vmem:[#allocation2 + $0x18] sm:$0xff] }
  0x3a   :  { %568 = vmatprep.subr.bf16.mxu1 %v567_v57  ;;  %v44_v18 = vld [vmem:[#allocation2 + $0x20] sm:$0xff]  ;;  %v45_v19 = vld [vmem:[#allocation2 + $0x28] sm:$0xff]  ;;  %v46_v20 = vld [vmem:[#allocation2 + $0x30] sm:$0xff] }
  0x3b   :  { %v47_v21 = vld [vmem:[#allocation2 + $0x38] sm:$0xff]  ;;  %v48_v22 = vld [vmem:[#allocation2 + $0x40] sm:$0xff]  ;;  %v49_v23 = vld [vmem:[#allocation2 + $0x48] sm:$0xff] }
  0x3c   :  { %546 = vmatpush1.bf16.msra.mxu0 %v545_v63  ;;  %v50_v24 = vld [vmem:[#allocation2 + $0x50] sm:$0xff]  ;;  %v51_v25 = vld [vmem:[#allocation2 + $0x58] sm:$0xff]  ;;  %v52_v26 = vld [vmem:[#allocation2 + $0x60] sm:$0xff] }
  0x3d   :  { %570 = vmatpush1.bf16.msra.mxu1 %v569_v1  ;;  %548 = vmatprep.subr.bf16.mxu0 %v547_v2 }
  0x3e   :  { %572 = vmatprep.subr.bf16.mxu1 %v571_v5 }
  0x40   :  { %550 = vmatpush1.bf16.msra.mxu0 %v549_v8 }
  0x41   :  { %574 = vmatpush1.bf16.msra.mxu1 %v573_v9  ;;  %169 = vmatprep.subr.mxu0 %v102_v10 }
  0x42   :  { %312 = vmatprep.subr.mxu1 %v104_v11 }
  0x44   :  { %170 = vmatpush1.msra.mxu0 %v101_v12 }
  0x45   :  { %313 = vmatpush1.msra.mxu1 %v103_v13  ;;  %501 = vmatmul.mubr.msk.f32.vlgmr.msra.gmra.mrb[0].mxu0 %vm105_vm0, %v40_v14 }
  0x46   :  { %514 = vmatmul.mubr.msk.f32.vlgmr.msra.gmra.mrb[0].mxu1 %vm105_vm0, %v40_v14  ;;  %215 = vmatprep.mubr.f32.mxu0 %v661_v0 }
  0x47   :  { %358 = vmatprep.mubr.f32.mxu1 %v661_v0 }
  0x49   :  { %502 = vmatmul.mubr.msk.f32.gmra.mrb[2].mxu0 %vm105_vm0, %v41_v15 }
  0x4a   :  { %515 = vmatmul.mubr.msk.f32.gmra.mrb[2].mxu1 %vm105_vm0, %v41_v15  ;;  %221 = vmatprep.mubr.f32.mxu0 %v661_v0 }
  0x4b   :  { %364 = vmatprep.mubr.f32.mxu1 %v661_v0 }
  0x4d   :  { %503 = vmatmul.mubr.msk.f32.gmra.mrb[4].mxu0 %vm105_vm0, %v42_v16 }
  0x4e   :  { %516 = vmatmul.mubr.msk.f32.gmra.mrb[4].mxu1 %vm105_vm0, %v42_v16  ;;  %227 = vmatprep.mubr.f32.mxu0 %v661_v0 }
  0x4f   :  { %370 = vmatprep.mubr.f32.mxu1 %v661_v0 }
  0x51   :  { %504 = vmatmul.mubr.msk.f32.gmra.mrb[6].mxu0 %vm105_vm0, %v43_v17 }
  0x52   :  { %517 = vmatmul.mubr.msk.f32.gmra.mrb[6].mxu1 %vm105_vm0, %v43_v17  ;;  %233 = vmatprep.mubr.f32.mxu0 %v661_v0 }
  0x53   :  { %376 = vmatprep.mubr.f32.mxu1 %v661_v0 }
  0x55   :  { %505 = vmatmul.mubr.msk.f32.gmra.mrb[8].mxu0 %vm105_vm0, %v44_v18 }
  0x56   :  { %518 = vmatmul.mubr.msk.f32.gmra.mrb[8].mxu1 %vm105_vm0, %v44_v18  ;;  %239 = vmatprep.mubr.f32.mxu0 %v661_v0 }
  0x57   :  { %382 = vmatprep.mubr.f32.mxu1 %v661_v0 }
  0x59   :  { %506 = vmatmul.mubr.msk.f32.gmra.mrb[10].mxu0 %vm105_vm0, %v45_v19 }
  0x5a   :  { %519 = vmatmul.mubr.msk.f32.gmra.mrb[10].mxu1 %vm105_vm0, %v45_v19  ;;  %245 = vmatprep.mubr.f32.mxu0 %v661_v0 }
  0x5b   :  { %388 = vmatprep.mubr.f32.mxu1 %v661_v0 }
  0x5d   :  { %507 = vmatmul.mubr.msk.f32.gmra.mrb[12].mxu0 %vm105_vm0, %v46_v20 }
  0x5e   :  { %520 = vmatmul.mubr.msk.f32.gmra.mrb[12].mxu1 %vm105_vm0, %v46_v20  ;;  %251 = vmatprep.mubr.f32.mxu0 %v661_v0 }
  0x5f   :  { %394 = vmatprep.mubr.f32.mxu1 %v661_v0 }
  0x61   :  { %508 = vmatmul.mubr.msk.f32.gmra.mrb[14].mxu0 %vm105_vm0, %v47_v21 }
  0x62   :  { %521 = vmatmul.mubr.msk.f32.gmra.mrb[14].mxu1 %vm105_vm0, %v47_v21  ;;  %257 = vmatprep.mubr.f32.mxu0 %v661_v0 }
  0x63   :  { %400 = vmatprep.mubr.f32.mxu1 %v661_v0 }
  0x65   :  { %509 = vmatmul.mubr.msk.f32.gmra.mrb[16].mxu0 %vm105_vm0, %v48_v22 }
  0x66   :  { %522 = vmatmul.mubr.msk.f32.gmra.mrb[16].mxu1 %vm105_vm0, %v48_v22  ;;  %263 = vmatprep.mubr.f32.mxu0 %v661_v0 }
  0x67   :  { %406 = vmatprep.mubr.f32.mxu1 %v661_v0 }
  0x69   :  { %510 = vmatmul.mubr.msk.f32.gmra.mrb[18].mxu0 %vm105_vm0, %v49_v23 }
  0x6a   :  { %523 = vmatmul.mubr.msk.f32.gmra.mrb[18].mxu1 %vm105_vm0, %v49_v23  ;;  %269 = vmatprep.mubr.f32.mxu0 %v661_v0 }
  0x6b   :  { %412 = vmatprep.mubr.f32.mxu1 %v661_v0 }
  0x6d   :  { %511 = vmatmul.mubr.msk.f32.gmra.mrb[20].mxu0 %vm105_vm0, %v50_v24 }
  0x6e   :  { %524 = vmatmul.mubr.msk.f32.gmra.mrb[20].mxu1 %vm105_vm0, %v50_v24  ;;  %275 = vmatprep.mubr.f32.mxu0 %v661_v0 }
  0x6f   :  { %418 = vmatprep.mubr.f32.mxu1 %v661_v0 }
  0x71   :  { %512 = vmatmul.mubr.msk.f32.gmra.mrb[22].mxu0 %vm105_vm0, %v51_v25 }
  0x72   :  { %525 = vmatmul.mubr.msk.f32.gmra.mrb[22].mxu1 %vm105_vm0, %v51_v25  ;;  %281 = vmatprep.mubr.f32.mxu0 %v661_v0 }
  0x73   :  { %424 = vmatprep.mubr.f32.mxu1 %v661_v0 }
  0x75   :  { %513 = vmatmul.mubr.msk.f32.gmra.mrb[24].mxu0 %vm105_vm0, %v52_v26 }
  0x76   :  { %526 = vmatmul.mubr.msk.f32.gmra.mrb[24].mxu1 %vm105_vm0, %v52_v26 }
 0x118   :  { %v211_v27 = vpop.f32.mrb[0].mxu0 }
 0x119   :  { %431 = vst [vmem:[#allocation7] sm:$0xff] %v211_v27  ;;  %v354_v28 = vpop.f32.mrb[0].mxu1  ;;  %v213_v29 = vpop.f32.mrb[1].mxu0 }
 0x11a   :  { %433 = vst [vmem:[#allocation7 + $0x10] sm:$0xff] %v354_v28  ;;  %432 = vst [vmem:[#allocation7 + $0x8] sm:$0xff] %v213_v29  ;;  %v356_v30 = vpop.f32.mrb[1].mxu1 }
 0x11b   :  { %434 = vst [vmem:[#allocation7 + $0x18] sm:$0xff] %v356_v30 }
 0x11c   :  { %v217_v31 = vpop.f32.mrb[2].mxu0 }
 0x11d   :  { %435 = vst [vmem:[#allocation7 + $0x20] sm:$0xff] %v217_v31  ;;  %v360_v32 = vpop.f32.mrb[2].mxu1  ;;  %v219_v33 = vpop.f32.mrb[3].mxu0 }
 0x11e   :  { %437 = vst [vmem:[#allocation7 + $0x30] sm:$0xff] %v360_v32  ;;  %436 = vst [vmem:[#allocation7 + $0x28] sm:$0xff] %v219_v33  ;;  %v362_v34 = vpop.f32.mrb[3].mxu1 }
 0x11f   :  { %438 = vst [vmem:[#allocation7 + $0x38] sm:$0xff] %v362_v34 }
 0x120   :  { %v223_v0 = vpop.f32.mrb[4].mxu0 }
 0x121   :  { %439 = vst [vmem:[#allocation7 + $0x40] sm:$0xff] %v223_v0  ;;  %v366_v35 = vpop.f32.mrb[4].mxu1  ;;  %v225_v36 = vpop.f32.mrb[5].mxu0 }
 0x122   :  { %441 = vst [vmem:[#allocation7 + $0x50] sm:$0xff] %v366_v35  ;;  %440 = vst [vmem:[#allocation7 + $0x48] sm:$0xff] %v225_v36  ;;  %v368_v37 = vpop.f32.mrb[5].mxu1 }
 0x123   :  { %442 = vst [vmem:[#allocation7 + $0x58] sm:$0xff] %v368_v37 }
 0x124   :  { %v229_v38 = vpop.f32.mrb[6].mxu0 }
 0x125   :  { %443 = vst [vmem:[#allocation7 + $0x60] sm:$0xff] %v229_v38  ;;  %v372_v39 = vpop.f32.mrb[6].mxu1  ;;  %v231_v40 = vpop.f32.mrb[7].mxu0 }
 0x126   :  { %445 = vst [vmem:[#allocation7 + $0x70] sm:$0xff] %v372_v39  ;;  %444 = vst [vmem:[#allocation7 + $0x68] sm:$0xff] %v231_v40  ;;  %v374_v41 = vpop.f32.mrb[7].mxu1 }
 0x127   :  { %446 = vst [vmem:[#allocation7 + $0x78] sm:$0xff] %v374_v41 }
 0x128   :  { %v235_v42 = vpop.f32.mrb[8].mxu0 }
 0x129   :  { %447 = vst [vmem:[#allocation7 + $0x80] sm:$0xff] %v235_v42  ;;  %v378_v43 = vpop.f32.mrb[8].mxu1  ;;  %v237_v44 = vpop.f32.mrb[9].mxu0 }
 0x12a   :  { %449 = vst [vmem:[#allocation7 + $0x90] sm:$0xff] %v378_v43  ;;  %448 = vst [vmem:[#allocation7 + $0x88] sm:$0xff] %v237_v44  ;;  %v380_v45 = vpop.f32.mrb[9].mxu1 }
 0x12b   :  { %450 = vst [vmem:[#allocation7 + $0x98] sm:$0xff] %v380_v45 }
 0x12c   :  { %v241_v46 = vpop.f32.mrb[10].mxu0 }
 0x12d   :  { %451 = vst [vmem:[#allocation7 + $0xa0] sm:$0xff] %v241_v46  ;;  %v384_v47 = vpop.f32.mrb[10].mxu1  ;;  %v243_v48 = vpop.f32.mrb[11].mxu0 }
 0x12e   :  { %453 = vst [vmem:[#allocation7 + $0xb0] sm:$0xff] %v384_v47  ;;  %452 = vst [vmem:[#allocation7 + $0xa8] sm:$0xff] %v243_v48  ;;  %v386_v49 = vpop.f32.mrb[11].mxu1 }
 0x12f   :  { %454 = vst [vmem:[#allocation7 + $0xb8] sm:$0xff] %v386_v49 }
 0x130   :  { %v247_v50 = vpop.f32.mrb[12].mxu0 }
 0x131   :  { %455 = vst [vmem:[#allocation7 + $0xc0] sm:$0xff] %v247_v50  ;;  %v390_v51 = vpop.f32.mrb[12].mxu1  ;;  %v249_v52 = vpop.f32.mrb[13].mxu0 }
 0x132   :  { %457 = vst [vmem:[#allocation7 + $0xd0] sm:$0xff] %v390_v51  ;;  %456 = vst [vmem:[#allocation7 + $0xc8] sm:$0xff] %v249_v52  ;;  %v392_v53 = vpop.f32.mrb[13].mxu1 }
 0x133   :  { %458 = vst [vmem:[#allocation7 + $0xd8] sm:$0xff] %v392_v53 }
 0x134   :  { %v253_v54 = vpop.f32.mrb[14].mxu0 }
 0x135   :  { %459 = vst [vmem:[#allocation7 + $0xe0] sm:$0xff] %v253_v54  ;;  %v396_v55 = vpop.f32.mrb[14].mxu1  ;;  %v255_v56 = vpop.f32.mrb[15].mxu0 }
 0x136   :  { %461 = vst [vmem:[#allocation7 + $0xf0] sm:$0xff] %v396_v55  ;;  %460 = vst [vmem:[#allocation7 + $0xe8] sm:$0xff] %v255_v56  ;;  %v398_v57 = vpop.f32.mrb[15].mxu1 }
 0x137   :  { %462 = vst [vmem:[#allocation7 + $0xf8] sm:$0xff] %v398_v57 }
 0x138   :  { %v259_v58 = vpop.f32.mrb[16].mxu0 }
 0x139   :  { %463 = vst [vmem:[#allocation7 + $0x100] sm:$0xff] %v259_v58  ;;  %v402_v59 = vpop.f32.mrb[16].mxu1  ;;  %v261_v60 = vpop.f32.mrb[17].mxu0 }
 0x13a   :  { %465 = vst [vmem:[#allocation7 + $0x110] sm:$0xff] %v402_v59  ;;  %464 = vst [vmem:[#allocation7 + $0x108] sm:$0xff] %v261_v60  ;;  %v404_v61 = vpop.f32.mrb[17].mxu1 }
 0x13b   :  { %466 = vst [vmem:[#allocation7 + $0x118] sm:$0xff] %v404_v61 }
 0x13c   :  { %v265_v62 = vpop.f32.mrb[18].mxu0 }
 0x13d   :  { %467 = vst [vmem:[#allocation7 + $0x120] sm:$0xff] %v265_v62  ;;  %v408_v63 = vpop.f32.mrb[18].mxu1  ;;  %v267_v1 = vpop.f32.mrb[19].mxu0 }
 0x13e   :  { %469 = vst [vmem:[#allocation7 + $0x130] sm:$0xff] %v408_v63  ;;  %468 = vst [vmem:[#allocation7 + $0x128] sm:$0xff] %v267_v1  ;;  %v410_v2 = vpop.f32.mrb[19].mxu1 }
 0x13f   :  { %470 = vst [vmem:[#allocation7 + $0x138] sm:$0xff] %v410_v2 }
 0x140   :  { %v271_v3 = vpop.f32.mrb[20].mxu0 }
 0x141   :  { %471 = vst [vmem:[#allocation7 + $0x140] sm:$0xff] %v271_v3  ;;  %v414_v4 = vpop.f32.mrb[20].mxu1  ;;  %v273_v5 = vpop.f32.mrb[21].mxu0 }
 0x142   :  { %473 = vst [vmem:[#allocation7 + $0x150] sm:$0xff] %v414_v4  ;;  %472 = vst [vmem:[#allocation7 + $0x148] sm:$0xff] %v273_v5  ;;  %v416_v6 = vpop.f32.mrb[21].mxu1 }
 0x143   :  { %474 = vst [vmem:[#allocation7 + $0x158] sm:$0xff] %v416_v6 }
 0x144   :  { %v277_v7 = vpop.f32.mrb[22].mxu0 }
 0x145   :  { %475 = vst [vmem:[#allocation7 + $0x160] sm:$0xff] %v277_v7  ;;  %v420_v8 = vpop.f32.mrb[22].mxu1  ;;  %v279_v9 = vpop.f32.mrb[23].mxu0 }
 0x146   :  { %477 = vst [vmem:[#allocation7 + $0x170] sm:$0xff] %v420_v8  ;;  %476 = vst [vmem:[#allocation7 + $0x168] sm:$0xff] %v279_v9  ;;  %v422_v10 = vpop.f32.mrb[23].mxu1 }
 0x147   :  { %478 = vst [vmem:[#allocation7 + $0x178] sm:$0xff] %v422_v10 }
 0x148   :  { %v283_v11 = vpop.f32.mrb[24].mxu0 }
 0x149   :  { %479 = vst [vmem:[#allocation7 + $0x180] sm:$0xff] %v283_v11  ;;  %v426_v12 = vpop.f32.mrb[24].mxu1  ;;  %v285_v13 = vpop.f32.mrb[25].mxu0 }
 0x14a   :  { %481 = vst [vmem:[#allocation7 + $0x190] sm:$0xff] %v426_v12  ;;  %480 = vst [vmem:[#allocation7 + $0x188] sm:$0xff] %v285_v13  ;;  %v428_v14 = vpop.f32.mrb[25].mxu1 }
 0x14b   :  { %482 = vst [vmem:[#allocation7 + $0x198] sm:$0xff] %v428_v14 }
 0x14c   :  { %638 = shalt.err (!%p635_p6)
}
 0x14d   :  { %s639_s12 = scalar_lea.hbm %s774_s2, 6656 }
 0x14e   :  { %p640_p7 = scmp.ne.s32.totalorder %s774_s2, %s639_s12  ;;  %p643_p8 = scmp.lt.u32.totalorder %s639_s12, %s774_s2 }
 0x150   :  { %p645_p9 = pnand %p643_p8, %p640_p7 }
 0x152   :  { %648 = shalt.err (!%p645_p9)
}
 0x153   :  { %494 = dma.vmem_to_hbm [thread:$0]  %s489_s8, 6656, %s774_s2, [#allocation4], %s659_s0, %s659_s0, %s660_s5  }
 0x154   :  { %653 = dma.done.wait [#allocation4], 6656  }
 0x155   :  { %654 = vsyncadd [#allocation4], 4294960640 }
 0x156   :  { %498 = vsyncpa [#allocation3], 1 }
 0x157   :  { %499 = vsyncpa [#allocation6], 1 }
 0x158   :  { %500 = vsyncpa [#allocation4], 1 }

</bundles_post_ra>
